<compile_context>
chip_gen: v7x
topology: tpu7x:2x2x1
jax: 0.10.0
libtpu: 0.0.40
codegen_flags: <defaults>
</compile_context>

<pallas_src>
import functools

import jax
import jax.numpy as jnp
from jax.experimental import pallas as pl
from jax.experimental.pallas import tpu as pltpu

_E4M3_MAX = 448.0                 # float8_e4m3fn max finite value
_RNE_MAGIC = float(1.5 * 2**23)   # add/sub trick => f32 round-to-nearest-even to integer
_QUANT_BLOCK_ELEMS = 512 * 1024   # ~knee of the per-grid-step overhead curve


def _round_up(x, m):
    return (x + m - 1) // m * m


def _device_kind():
    try:
        return jax.devices()[0].device_kind.lower()
    except Exception:
        return ""


def _vmem_capacity(kind):
    try:
        cap = int(pltpu.get_tpu_info().vmem_capacity_bytes)
    except Exception:
        cap = (64 << 20) if "7" in kind else (128 << 20)
    if "7" in kind:                       # v7x: 64 MiB per TensorCore
        cap = min(cap, 64 << 20)
    return cap


def _gen_matmul_tiles(kind):
    """(tm, tn, tk) targets: MXU-bound per K-step and AI above the HBM roofline."""
    if "7" in kind:                       # v7x: AI=341 >= ~311 flop/B per TC, small VMEM
        return 512, 1024, 1024
    if "v6" in kind:                      # v6e: AI=683 >= ~670 flop/B, ~22 MiB VMEM
        return 1024, 2048, 512
    if "v5" in kind:                      # v5e: AI=341 >= ~240 flop/B
        return 512, 1024, 512
    return 512, 1024, 512                 # conservative default for unknown chips


@functools.lru_cache(maxsize=None)
def _fp8_support():
    """Probe once whether Mosaic on this chip can (a) store/convert float8_e4m3fn refs and
    (b) feed fp8 operands directly to the MXU (v7x). Any failure -> graceful fallback."""
    x8 = jax.ShapeDtypeStruct((32, 128), jnp.float8_e4m3fn)

    def conv_probe(x_ref, bf_ref, f8_ref):
        xb = x_ref[...].astype(jnp.bfloat16)              # fp8 -> bf16 (matmul load path)
        bf_ref[...] = xb
        xf = xb.astype(jnp.float32) * 0.5
        f8_ref[...] = jnp.clip(xf, -_E4M3_MAX, _E4M3_MAX).astype(jnp.float8_e4m3fn)

    try:
        fn = pl.pallas_call(
            conv_probe,
            out_shape=(jax.ShapeDtypeStruct((32, 128), jnp.bfloat16),
                       jax.ShapeDtypeStruct((32, 128), jnp.float8_e4m3fn)))
        jax.jit(fn).lower(x8).compile()
        store_ok = True
    except Exception:
        return False, False

    dot_ok = False
    if "7" in _device_kind():             # only v7x's MXU takes fp8 operands natively
        def dot_probe(a_ref, b_ref, o_ref):
            o_ref[...] = jnp.dot(a_ref[...], b_ref[...],
                                 preferred_element_type=jnp.float32)
        try:
            a8 = jax.ShapeDtypeStruct((128, 128), jnp.float8_e4m3fn)
            fn = pl.pallas_call(dot_probe,
                                out_shape=jax.ShapeDtypeStruct((128, 128), jnp.float32))
            jax.jit(fn).lower(a8, a8).compile()
            dot_ok = True
        except Exception:
            dot_ok = False
    return store_ok, dot_ok


def _prep_scales(scale_input, scale_other):
    # Mirror the torch module: scale_input is a bf16 scalar tensor and 1.0/scale_input is
    # computed in bf16; scale_other (and its reciprocal) keep the caller's precision.
    s_in = float(jnp.bfloat16(scale_input))
    inv_in = float(jnp.bfloat16(1.0 / s_in))
    s_ot = float(scale_other)
    inv_ot = 1.0 / s_ot
    return s_in, s_ot, inv_in * inv_ot


# ---------------------------------------------------------------------------
# Pass 1: elementwise quantization (run once per operand, memory-bound)
# ---------------------------------------------------------------------------
def _e4m3_round_f32(x):
    """Saturating RNE rounding of f32 `x` onto the e4m3fn grid, in f32 (fallback path).
    ~10 VALU ops/elem: clip + single masked-exponent bitcast for ulp / 1/ulp (both exact
    powers of two), then the 1.5*2^23 round-to-nearest-even trick.
    NOTE: relies on default (non-fast-math) XLA; the fp8 path below avoids it entirely."""
    x = jnp.clip(x, -_E4M3_MAX, _E4M3_MAX)                        # saturating e4m3fn
    bits = pltpu.bitcast(x, jnp.int32)
    # clamp exponent at -6 (=> subnormal step 2^-9); e_shift = clamped_exponent << 23
    e_shift = jnp.maximum(bits & 0x7F800000, 121 << 23) - (127 << 23)
    ulp = pltpu.bitcast((124 << 23) + e_shift, jnp.float32)       # 2^(e-3)
    inv_ulp = pltpu.bitcast((130 << 23) - e_shift, jnp.float32)   # 2^(3-e), exact
    r = (x * inv_ulp + _RNE_MAGIC) - _RNE_MAGIC                   # |x*inv_ulp| < 16, RNE
    return r * ulp


def _quant_kernel_bf16(x_ref, o_ref, *, scale):
    xq = _e4m3_round_f32(x_ref[...].astype(jnp.float32) * scale)
    o_ref[...] = xq.astype(jnp.bfloat16)                          # e4m3 values exact in bf16


def _quant_kernel_fp8(x_ref, o_ref, *, scale):
    x = x_ref[...].astype(jnp.float32) * scale
    x = jnp.clip(x, -_E4M3_MAX, _E4M3_MAX)                        # saturate (HPU cast mode)
    o_ref[...] = x.astype(jnp.float8_e4m3fn)                      # hardware RNE cast


def _row_tile(rows, cols, gran):
    tr = max(gran, min(rows, (_QUANT_BLOCK_ELEMS // max(cols, 1)) // gran * gran))
    while rows % tr:
        tr -= gran
    return tr


def _quantize(x, scale, out_dtype, gran, vmem_limit):
    rows, cols = x.shape            # already padded: rows % gran == 0, cols % 128 == 0
    tr = _row_tile(rows, cols, gran)
    kernel = _quant_kernel_fp8 if out_dtype == jnp.float8_e4m3fn else _quant_kernel_bf16
    return pl.pallas_call(
        functools.partial(kernel, scale=float(scale)),
        out_shape=jax.ShapeDtypeStruct((rows, cols), out_dtype),
        grid_spec=pltpu.PrefetchScalarGridSpec(
            num_scalar_prefetch=0,
            grid=(rows // tr,),
            in_specs=[pl.BlockSpec((tr, cols), lambda i: (i, 0))],   # lane-dense blocks
            out_specs=pl.BlockSpec((tr, cols), lambda i: (i, 0)),
        ),
        compiler_params=pltpu.CompilerParams(
            dimension_semantics=("parallel",),
            vmem_limit_bytes=vmem_limit),
    )(x)


# ---------------------------------------------------------------------------
# Pass 2: tiled MXU matmul on pre-quantized operands, dequant on the way out
# ---------------------------------------------------------------------------
def _matmul_kernel(a_ref, b_ref, o_ref, acc_ref, *, dequant, upcast):
    @pl.when(pl.program_id(2) == 0)
    def _():
        acc_ref[...] = jnp.zeros_like(acc_ref)

    a = a_ref[...]
    b = b_ref[...]
    if upcast:      # fp8-stored operands on v5e/v6e: VPU upcast hides under the MXU
        a = a.astype(jnp.bfloat16)
        b = b.astype(jnp.bfloat16)
    acc_ref[...] += jnp.dot(a, b, preferred_element_type=jnp.float32)

    @pl.when(pl.program_id(2) == pl.num_programs(2) - 1)
    def _():
        o_ref[...] = (acc_ref[...] * dequant).astype(o_ref.dtype)


def fp8_matmul(a, b, *, scale_input=1.0, scale_other=1.0):
    """bf16 out = dequant( q_e4m3(a*scale_input) @ q_e4m3(b*scale_other) )."""
    M, K = a.shape
    K2, N = b.shape
    assert K == K2, "inner dimensions must match"

    kind = _device_kind()
    store_fp8, native_fp8_dot = _fp8_support()
    q_dtype = jnp.float8_e4m3fn if store_fp8 else jnp.bfloat16
    q_itemsize = 1 if store_fp8 else 2
    gran_m = 32 if store_fp8 else 8          # fp8 native tile is (32, 128)
    s_in, s_ot, dequant = _prep_scales(scale_input, scale_other)

    # ---- generation-aware tile selection + VMEM budget --------------------------------
    cap = _vmem_capacity(kind)
    tm_t, tn_t, tk_t = _gen_matmul_tiles(kind)

    def vmem_need(tm_, tn_, tk_):            # 2x-buffered A/B/out tiles + f32 accumulator
        return (2 * (tm_ * tk_ * q_itemsize + tk_ * tn_ * q_itemsize + tm_ * tn_ * 2)
                + tm_ * tn_ * 4)

    while vmem_need(tm_t, tn_t, tk_t) > (cap * 6) // 10:   # safety: never overshoot VMEM
        if tn_t >= max(tm_t, tk_t) and tn_t > 256:
            tn_t //= 2
        elif tm_t >= tk_t and tm_t > 256:
            tm_t //= 2
        elif tk_t > 256:
            tk_t //= 2
        else:
            break

    # Clamp tiles to (padded) problem dims; pad so every tile divides evenly.
    tm = min(tm_t, _round_up(M, gran_m)); Mp = _round_up(M, tm)
    tk = min(tk_t, _round_up(K, 128));    Kp = _round_up(K, tk)
    tn = min(tn_t, _round_up(N, 128));    Np = _round_up(N, tn)

    if (Mp, Kp) != (M, K):
        a = jnp.pad(a, ((0, Mp - M), (0, Kp - K)))          # zeros quantize to 0 -> no-op
    if (Kp, Np) != (K, N):
        b = jnp.pad(b, ((0, Kp - K), (0, Np - N)))

    vneed = vmem_need(tm, tn, tk)
    vmem_limit = min((cap * 3) // 4, max(2 * vneed, 64 << 20))   # 64 MiB v5e/v6e, 48 MiB v7x
    vmem_limit = max(vmem_limit, vneed + (8 << 20))
    quant_vmem_limit = min((cap * 3) // 4, 64 << 20)

    # ---- pass 1: quantize each operand once ------------------------------------------
    qa = _quantize(a, s_in, q_dtype, gran_m, quant_vmem_limit)
    qb = _quantize(b, s_ot, q_dtype, 32, quant_vmem_limit)

    # ---- pass 2: tiled MXU matmul, K innermost ("arbitrary"), dequant on final store --
    # (i, j) are "parallel": on v7x the megacore split engages whenever Mp//tm or Np//tn >= 2.
    out = pl.pallas_call(
        functools.partial(_matmul_kernel, dequant=dequant,
                          upcast=store_fp8 and not native_fp8_dot),
        out_shape=jax.ShapeDtypeStruct((Mp, Np), jnp.bfloat16),
        grid_spec=pltpu.PrefetchScalarGridSpec(
            num_scalar_prefetch=0,
            grid=(Mp // tm, Np // tn, Kp // tk),
            in_specs=[
                pl.BlockSpec((tm, tk), lambda i, j, k: (i, k)),
                pl.BlockSpec((tk, tn), lambda i, j, k: (k, j)),
            ],
            out_specs=pl.BlockSpec((tm, tn), lambda i, j, k: (i, j)),
            scratch_shapes=[pltpu.VMEM((tm, tn), jnp.float32)],
        ),
        compiler_params=pltpu.CompilerParams(
            dimension_semantics=("parallel", "parallel", "arbitrary"),
            vmem_limit_bytes=vmem_limit),
    )(qa, qb)

    if (Mp, Np) != (M, N):
        out = out[:M, :N]
    return out


# ---------------------------------------------------------------------------
# Pure-JAX (non-Pallas) reference of the same math, for correctness checking
# ---------------------------------------------------------------------------
def _reference(a, b, scale_input, scale_other):
    s_in, s_ot, dequant = _prep_scales(scale_input, scale_other)

    def quant(x, s):
        x = jnp.clip(x.astype(jnp.float32) * s, -_E4M3_MAX, _E4M3_MAX)
        bits = jax.lax.bitcast_convert_type(x, jnp.int32)
        e_shift = jnp.maximum(bits & 0x7F800000, 121 << 23) - (127 << 23)
        ulp = jax.lax.bitcast_convert_type((124 << 23) + e_shift, jnp.float32)
        inv_ulp = jax.lax.bitcast_convert_type((130 << 23) - e_shift, jnp.float32)
        r = (x * inv_ulp + _RNE_MAGIC) - _RNE_MAGIC
        return r * ulp

    out = jnp.dot(quant(a, s_in), quant(b, s_ot),
                  preferred_element_type=jnp.float32) * dequant
    return out.astype(jnp.bfloat16).astype(jnp.float32)


if __name__ == "__main__":
    key = jax.random.PRNGKey(0)
    k1, k2, k3, k4 = jax.random.split(key, 4)

    scale_input, scale_other = 1.0, 2.0   # module: bf16 tensor(1.0) / __init__ argument

    # Case 1: MXU-aligned small shapes (tiles clamp down to the problem dims).
    M, K, N = 128, 512, 256
    a = jax.random.normal(k1, (M, K), dtype=jnp.bfloat16)   # "input"
    b = jax.random.normal(k2, (K, N), dtype=jnp.bfloat16)   # "other"
    out = fp8_matmul(a, b, scale_input=scale_input, scale_other=scale_other)
    jax.block_until_ready(out)
    assert out.shape == (M, N) and out.dtype == jnp.bfloat16
    ref = _reference(a, b, scale_input, scale_other)
    assert bool(jnp.allclose(out.astype(jnp.float32), ref, rtol=5e-2, atol=5e-2)), \
        "aligned-shape mismatch vs reference"

    # Case 2: ragged shapes (exercises the zero-padding path).
    M2, K2, N2 = 40, 200, 100
    a2 = jax.random.normal(k3, (M2, K2), dtype=jnp.bfloat16)
    b2 = jax.random.normal(k4, (K2, N2), dtype=jnp.bfloat16)
    out2 = fp8_matmul(a2, b2, scale_input=scale_input, scale_other=scale_other)
    jax.block_until_ready(out2)
    assert out2.shape == (M2, N2) and out2.dtype == jnp.bfloat16
    ref2 = _reference(a2, b2, scale_input, scale_other)
    assert bool(jnp.allclose(out2.astype(jnp.float32), ref2, rtol=5e-2, atol=5e-2)), \
        "ragged-shape mismatch vs reference"

    print("KERNEL_OK")
</pallas_src>

<mosaic_0001>
module attributes {stable_mosaic.version = 11 : i64} {
  func.func @_quant_kernel_bf16(%arg0: i32, %arg1: memref<128x512xbf16, #tpu.memory_space<vmem>>, %arg2: memref<128x512xbf16, #tpu.memory_space<vmem>>) attributes {dimension_semantics = [#tpu.dimension_semantics<parallel>], iteration_bounds = array<i64: 1>, scalar_prefetch = 0 : i64, scratch_operands = 0 : i64, tpu.core_type = #tpu.core_type<tc>, window_params = [{transform_indices = @transform_0, window_bounds = array<i64: 128, 512>}, {transform_indices = @transform_1, window_bounds = array<i64: 128, 512>}]} {
    %c0 = arith.constant 0 : index
    %c0_0 = arith.constant 0 : index
    %0 = vector.load %arg1[%c0, %c0_0] : memref<128x512xbf16, #tpu.memory_space<vmem>>, vector<128x512xbf16>
    %1 = arith.extf %0 : vector<128x512xbf16> to vector<128x512xf32>
    %cst = arith.constant 1.000000e+00 : f32
    %2 = vector.broadcast %cst : f32 to vector<128x512xf32>
    %3 = arith.mulf %1, %2 : vector<128x512xf32>
    %cst_1 = arith.constant -4.480000e+02 : f32
    %cst_2 = arith.constant 4.480000e+02 : f32
    %4 = vector.broadcast %cst_1 : f32 to vector<128x512xf32>
    %5 = arith.maximumf %4, %3 : vector<128x512xf32>
    %6 = vector.broadcast %cst_2 : f32 to vector<128x512xf32>
    %7 = arith.minimumf %6, %5 : vector<128x512xf32>
    %8 = tpu.bitcast %7 : vector<128x512xf32> -> vector<128x512xi32>
    %c2139095040_i32 = arith.constant 2139095040 : i32
    %9 = vector.broadcast %c2139095040_i32 : i32 to vector<128x512xi32>
    %10 = arith.andi %8, %9 : vector<128x512xi32>
    %c1015021568_i32 = arith.constant 1015021568 : i32
    %11 = vector.broadcast %c1015021568_i32 : i32 to vector<128x512xi32>
    %12 = arith.maxsi %10, %11 : vector<128x512xi32>
    %c1065353216_i32 = arith.constant 1065353216 : i32
    %13 = vector.broadcast %c1065353216_i32 : i32 to vector<128x512xi32>
    %14 = arith.subi %12, %13 : vector<128x512xi32>
    %c1040187392_i32 = arith.constant 1040187392 : i32
    %15 = vector.broadcast %c1040187392_i32 : i32 to vector<128x512xi32>
    %16 = arith.addi %15, %14 : vector<128x512xi32>
    %17 = tpu.bitcast %16 : vector<128x512xi32> -> vector<128x512xf32>
    %c1090519040_i32 = arith.constant 1090519040 : i32
    %18 = vector.broadcast %c1090519040_i32 : i32 to vector<128x512xi32>
    %19 = arith.subi %18, %14 : vector<128x512xi32>
    %20 = tpu.bitcast %19 : vector<128x512xi32> -> vector<128x512xf32>
    %21 = arith.mulf %7, %20 : vector<128x512xf32>
    %cst_3 = arith.constant 0x4B400000 : f32
    %22 = vector.broadcast %cst_3 : f32 to vector<128x512xf32>
    %23 = arith.addf %21, %22 : vector<128x512xf32>
    %cst_4 = arith.constant 0x4B400000 : f32
    %24 = vector.broadcast %cst_4 : f32 to vector<128x512xf32>
    %25 = arith.subf %23, %24 : vector<128x512xf32>
    %26 = arith.mulf %25, %17 : vector<128x512xf32>
    %27 = arith.truncf %26 : vector<128x512xf32> to vector<128x512xbf16>
    %c0_5 = arith.constant 0 : index
    %c0_6 = arith.constant 0 : index
    %28 = vector.load %arg2[%c0_5, %c0_6] : memref<128x512xbf16, #tpu.memory_space<vmem>>, vector<128x512xbf16>
    tpu.vector_store %arg2[%c0_5, %c0_6], %27 {strides = array<i32>} : memref<128x512xbf16, #tpu.memory_space<vmem>>, vector<128x512xbf16>,
    return
  }
  func.func @transform_0(%arg0: i32) -> (i32, i32) {
    %c0_i32 = arith.constant 0 : i32
    %c0_i32_0 = arith.constant 0 : i32
    return %arg0, %c0_i32 : i32, i32
  }
  func.func @transform_1(%arg0: i32) -> (i32, i32) {
    %c0_i32 = arith.constant 0 : i32
    %c0_i32_0 = arith.constant 0 : i32
    return %arg0, %c0_i32 : i32, i32
  }
}

</mosaic_0001>

<bundles_post_ra>
// kernel: tpu_custom_call.1
= control target key start
LH: loop header
LB: loop body
LE: loop exit
PB: predicated region body
PF: predicated region fallthrough
CT: control target
= control target key end

     0   :  { %6 = vsyncpa [#allocation3], 0  ;;  %s1692_s0 = inlined_call_operand.hbm [shape: bf16[128,512], index: 0, kind: input, shape index: {}]   ;;  %s1693_s1 = inlined_call_operand.hbm [shape: bf16[128,512], index: 1, kind: output, shape index: {}]  }
   0x1   :  { %7 = vsyncpa [#allocation4], 0  ;;  %s1628_s6 = smov [#allocation2]   ;;  %s1580_s10 = scalar_lea.hbm %s1692_s0, 4096 }
   0x2   :  { %s13_s7 = sshll.u32 %s1628_s6, 4  ;;  %p1581_p0 = scmp.ne.s32.totalorder %s1692_s0, %s1580_s10  ;;  %s14_s7 = int_to_ptr.vmem [resolvable:$true] %s13_s7 }
   0x3   :  { %p1584_p1 = scmp.lt.u32.totalorder %s1580_s10, %s1692_s0 }
   0x5   :  { %p1586_p2 = pnand %p1584_p1, %p1581_p0 }
   0x7   :  { %1589 = shalt.err (!%p1586_p2)
}
   0x8   :  { %s1590_s15 = scalar_lea.vmem %s14_s7, 4096  ;;  %p1595_p4 = scmp.lt.s32.totalorder %s14_s7, %s14_s7 }
   0x9   :  { %p1591_p3 = scmp.ne.s32.totalorder %s14_s7, %s1590_s15  ;;  %p1596_p5 = scmp.lt.s32.totalorder %s1590_s15, %s1590_s15 }
   0xb   :  { %p1597_p6 = por %p1596_p5, %p1595_p4 }
   0xd   :  { %p1598_p7 = pnand %p1597_p6, %p1591_p3 }
   0xf   :  { %1601 = shalt.err (!%p1598_p7)
}
  0x10   :  { %s1629_s16 = smov 256   ;;  %s1630_s17 = smov 16  }
  0x11   :  { %19 = dma.hbm_to_vmem [thread:$0]  %s1692_s0, 4096, %s14_s7, [#allocation3], %s1629_s16, %s1629_s16, %s1630_s17  }
  0x12   :  { %1624 = dma.done.wait [#allocation3], 4096  }
  0x13   :  { %1625 = vsyncadd [#allocation3], 4294963200  ;;  %v23_v0 = vld [vmem:[#allocation2] sm:$0xff]  ;;  %v24_v1 = vld [vmem:[#allocation2 + $0x8] sm:$0xff]  ;;  %s1631_s0 = smov [#allocation5]  }
  0x14   :  { %v25_v2 = vld [vmem:[#allocation2 + $0x10] sm:$0xff]  ;;  %v55_v3 = vunpack.c.l.bf16 %v23_v0  ;;  %v56_v4 = vunpack.c.h.bf16 %v23_v0  ;;  %v57_v5 = vunpack.c.l.bf16 %v24_v1  ;;  %v58_v6 = vunpack.c.h.bf16 %v24_v1  ;;  %v26_v7 = vld [vmem:[#allocation2 + $0x18] sm:$0xff]  ;;  %s1308_s20 = sshll.u32 %s1631_s0, 4  ;;  %s1309_s20 = int_to_ptr.vmem [resolvable:$true] %s1308_s20 }
  0x15   :  { %v59_v8 = vunpack.c.l.bf16 %v25_v2  ;;  %v60_v9 = vunpack.c.h.bf16 %v25_v2  ;;  %v61_v10 = vunpack.c.l.bf16 %v26_v7  ;;  %v62_v11 = vunpack.c.h.bf16 %v26_v7  ;;  %s1602_s21 = scalar_lea.vmem %s1309_s20, 4096  ;;  %p1607_p9 = scmp.lt.s32.totalorder %s1309_s20, %s1309_s20 }
  0x16   :  { %v1320_v12 = vclamps-f32 %v55_v3, 448.0  ;;  %v1321_v13 = vclamps-f32 %v56_v4, 448.0  ;;  %v1322_v14 = vclamps-f32 %v57_v5, 448.0  ;;  %v1323_v15 = vclamps-f32 %v58_v6, 448.0  ;;  %p1603_p8 = scmp.ne.s32.totalorder %s1309_s20, %s1602_s21  ;;  %p1608_p10 = scmp.lt.s32.totalorder %s1602_s21, %s1602_s21 }
  0x17   :  { %v1324_v16 = vclamps-f32 %v59_v8, 448.0  ;;  %v1325_v17 = vclamps-f32 %v60_v9, 448.0  ;;  %v1657_v18 = vclamps-f32 %v61_v10, 448.0  ;;  %v1659_v19 = vclamps-f32 %v62_v11, 448.0  ;;  %v27_v10 = vld [vmem:[#allocation2 + $0x20] sm:$0xff] }
  0x18   :  { %v311_v20 = vand.u32 2139095040, %v1320_v12  ;;  %v312_v21 = vand.u32 2139095040, %v1321_v13  ;;  %v313_v22 = vand.u32 2139095040, %v1322_v14  ;;  %v314_v23 = vand.u32 2139095040, %v1323_v15  ;;  %p1609_p11 = por %p1608_p10, %p1607_p9 }
  0x19   :  { %v315_v24 = vand.u32 2139095040, %v1324_v16  ;;  %v316_v25 = vand.u32 2139095040, %v1325_v17  ;;  %v317_v26 = vand.u32 2139095040, %v1657_v18  ;;  %v318_v27 = vand.u32 2139095040, %v1659_v19 }
  0x1a   :  { %vm375_vm0 = vcmp.gt.s32.totalorder %v311_v20, 1015021568  ;;  %vm377_vm1 = vcmp.gt.s32.totalorder %v312_v21, 1015021568  ;;  %vm379_vm2 = vcmp.gt.s32.totalorder %v313_v22, 1015021568  ;;  %vm381_vm3 = vcmp.gt.s32.totalorder %v314_v23, 1015021568  ;;  %p1610_p12 = pnand %p1609_p11, %p1603_p8 }
  0x1b   :  { %v376_v28 = vsel %vm375_vm0, %v311_v20, 1015021568  ;;  %v378_v29 = vsel %vm377_vm1, %v312_v21, 1015021568  ;;  %v380_v30 = vsel %vm379_vm2, %v313_v22, 1015021568  ;;  %v382_v31 = vsel %vm381_vm3, %v314_v23, 1015021568 }
  0x1c   :  { %v1384_v32 = vadd.s32 3229614080, %v376_v28  ;;  %v1385_v33 = vadd.s32 3229614080, %v378_v29  ;;  %v1386_v34 = vadd.s32 3229614080, %v380_v30  ;;  %v1387_v35 = vadd.s32 3229614080, %v382_v31 }
  0x1d   :  { %vm383_vm4 = vcmp.gt.s32.totalorder %v315_v24, 1015021568  ;;  %vm385_vm5 = vcmp.gt.s32.totalorder %v316_v25, 1015021568  ;;  %vm1663_vm6 = vcmp.gt.s32.totalorder %v317_v26, 1015021568  ;;  %vm1667_vm7 = vcmp.gt.s32.totalorder %v318_v27, 1015021568 }
  0x1e   :  { %v567_v38 = vadd.s32 1040187392, %v1384_v32  ;;  %v568_v39 = vadd.s32 1040187392, %v1385_v33  ;;  %v695_v40 = vsub.s32 1090519040, %v1384_v32  ;;  %v696_v41 = vsub.s32 1090519040, %v1385_v33 }
  0x1f   :  { %v569_v42 = vadd.s32 1040187392, %v1386_v34  ;;  %v570_v43 = vadd.s32 1040187392, %v1387_v35  ;;  %v697_v44 = vsub.s32 1090519040, %v1386_v34  ;;  %v698_v45 = vsub.s32 1090519040, %v1387_v35  ;;  %v29_v34 = vld [vmem:[#allocation2 + $0x30] sm:$0xff] }
  0x20   :  { %v823_v46 = vmul.f32 %v1320_v12, %v695_v40  ;;  %v824_v47 = vmul.f32 %v1321_v13, %v696_v41  ;;  %v384_v48 = vsel %vm383_vm4, %v315_v24, 1015021568  ;;  %v386_v49 = vsel %vm385_vm5, %v316_v25, 1015021568 }
  0x21   :  { %v825_v50 = vmul.f32 %v1322_v14, %v697_v44  ;;  %v826_v51 = vmul.f32 %v1323_v15, %v698_v45  ;;  %v1388_v52 = vadd.s32 3229614080, %v384_v48  ;;  %v1389_v53 = vadd.s32 3229614080, %v386_v49  ;;  %v28_v15 = vld [vmem:[#allocation2 + $0x28] sm:$0xff] }
  0x22   :  { %v887_v54 = vadd.f32 12582912.0, %v823_v46  ;;  %v888_v55 = vadd.f32 12582912.0, %v824_v47  ;;  %v388_v56 = vsel %vm1663_vm6, %v317_v26, 1015021568  ;;  %v390_v57 = vsel %vm1667_vm7, %v318_v27, 1015021568 }
  0x23   :  { %v889_v58 = vadd.f32 12582912.0, %v825_v50  ;;  %v890_v59 = vadd.f32 12582912.0, %v826_v51  ;;  %v571_v60 = vadd.s32 1040187392, %v1388_v52  ;;  %v572_v61 = vadd.s32 1040187392, %v1389_v53 }
  0x24   :  { %v1448_v62 = vadd.f32 -12582912.0, %v887_v54  ;;  %v1449_v63 = vadd.f32 -12582912.0, %v888_v55  ;;  %v699_v0 = vsub.s32 1090519040, %v1388_v52  ;;  %v700_v1 = vsub.s32 1090519040, %v1389_v53 }
  0x25   :  { %v1450_v2 = vadd.f32 -12582912.0, %v889_v58  ;;  %v1451_v3 = vadd.f32 -12582912.0, %v890_v59  ;;  %v1390_v4 = vadd.s32 3229614080, %v388_v56  ;;  %v1391_v5 = vadd.s32 3229614080, %v390_v57 }
  0x26   :  { %v1015_v6 = vmul.f32 %v1448_v62, %v567_v38  ;;  %v1016_v7 = vmul.f32 %v1449_v63, %v568_v39  ;;  %v827_v8 = vmul.f32 %v1324_v16, %v699_v0  ;;  %v828_v9 = vmul.f32 %v1325_v17, %v700_v1 }
  0x27   :  { %v1017_v11 = vmul.f32 %v1450_v2, %v569_v42  ;;  %v1018_v12 = vmul.f32 %v1451_v3, %v570_v43  ;;  %v573_v13 = vadd.s32 1040187392, %v1390_v4  ;;  %v574_v14 = vadd.s32 1040187392, %v1391_v5 }
  0x28   :  { %v1544_v20 = vpack.c.bf16 %v1016_v7, %v1015_v6  ;;  %v891_v21 = vadd.f32 12582912.0, %v827_v8  ;;  %v892_v22 = vadd.f32 12582912.0, %v828_v9  ;;  %v701_v23 = vsub.s32 1090519040, %v1390_v4 }
  0x29   :  { %v1545_v24 = vpack.c.bf16 %v1018_v12, %v1017_v11  ;;  %v702_v25 = vsub.s32 1090519040, %v1391_v5  ;;  %v63_v26 = vunpack.c.l.bf16 %v27_v10  ;;  %v64_v27 = vunpack.c.h.bf16 %v27_v10 }
  0x2a   :  { %1271 = vst [vmem:[#allocation5] sm:$0xff] %v1544_v20  ;;  %v1452_v28 = vadd.f32 -12582912.0, %v891_v21  ;;  %v1453_v29 = vadd.f32 -12582912.0, %v892_v22  ;;  %v829_v16 = vmul.f32 %v1657_v18, %v701_v23  ;;  %v65_v17 = vunpack.c.l.bf16 %v28_v15 }
  0x2b   :  { %1272 = vst [vmem:[#allocation5 + $0x8] sm:$0xff] %v1545_v24  ;;  %v830_v30 = vmul.f32 %v1659_v19, %v702_v25  ;;  %v1328_v31 = vclamps-f32 %v63_v26, 448.0  ;;  %v1329_v32 = vclamps-f32 %v64_v27, 448.0  ;;  %v66_v33 = vunpack.c.h.bf16 %v28_v15 }
  0x2c   :  { %v1019_v35 = vmul.f32 %v1452_v28, %v571_v60  ;;  %v1020_v36 = vmul.f32 %v1453_v29, %v572_v61  ;;  %v893_v37 = vadd.f32 12582912.0, %v829_v16  ;;  %v1330_v38 = vclamps-f32 %v65_v17, 448.0  ;;  %v30_v61 = vld [vmem:[#allocation2 + $0x38] sm:$0xff] }
  0x2d   :  { %v894_v39 = vadd.f32 12582912.0, %v830_v30  ;;  %v319_v40 = vand.u32 2139095040, %v1328_v31  ;;  %v320_v41 = vand.u32 2139095040, %v1329_v32  ;;  %v1331_v42 = vclamps-f32 %v66_v33, 448.0  ;;  %v31_v30 = vld [vmem:[#allocation2 + $0x40] sm:$0xff] }
  0x2e   :  { %v1546_v43 = vpack.c.bf16 %v1020_v36, %v1019_v35  ;;  %v1454_v44 = vadd.f32 -12582912.0, %v893_v37  ;;  %v321_v45 = vand.u32 2139095040, %v1330_v38  ;;  %v67_v18 = vunpack.c.l.bf16 %v29_v34 }
  0x2f   :  { %v1455_v46 = vadd.f32 -12582912.0, %v894_v39  ;;  %vm391_vm8 = vcmp.gt.s32.totalorder %v319_v40, 1015021568  ;;  %vm393_vm9 = vcmp.gt.s32.totalorder %v320_v41, 1015021568  ;;  %v322_v19 = vand.u32 2139095040, %v1331_v42 }
  0x30   :  { %1273 = vst [vmem:[#allocation5 + $0x10] sm:$0xff] %v1546_v43  ;;  %v1021_v47 = vmul.f32 %v1454_v44, %v573_v13  ;;  %v392_v48 = vsel %vm391_vm8, %v319_v40, 1015021568  ;;  %v394_v49 = vsel %vm393_vm9, %v320_v41, 1015021568  ;;  %vm395_vm10 = vcmp.gt.s32.totalorder %v321_v45, 1015021568 }
  0x31   :  { %v1022_v50 = vmul.f32 %v1455_v46, %v574_v14  ;;  %v1392_v51 = vadd.s32 3229614080, %v392_v48  ;;  %v1393_v52 = vadd.s32 3229614080, %v394_v49  ;;  %v396_v53 = vsel %vm395_vm10, %v321_v45, 1015021568 }
  0x32   :  { %vm397_vm11 = vcmp.gt.s32.totalorder %v322_v19, 1015021568  ;;  %v1394_v54 = vadd.s32 3229614080, %v396_v53  ;;  %v68_v55 = vunpack.c.h.bf16 %v29_v34  ;;  %v1332_v56 = vclamps-f32 %v67_v18, 448.0 }
  0x33   :  { %v1547_v57 = vpack.c.bf16 %v1022_v50, %v1021_v47  ;;  %v575_v58 = vadd.s32 1040187392, %v1392_v51  ;;  %v576_v59 = vadd.s32 1040187392, %v1393_v52  ;;  %v703_v60 = vsub.s32 1090519040, %v1392_v51  ;;  %v32_v47 = vld [vmem:[#allocation2 + $0x48] sm:$0xff] }
  0x34   :  { %v704_v62 = vsub.s32 1090519040, %v1393_v52  ;;  %v398_v63 = vsel %vm397_vm11, %v322_v19, 1015021568  ;;  %v577_v0 = vadd.s32 1040187392, %v1394_v54  ;;  %v705_v1 = vsub.s32 1090519040, %v1394_v54 }
  0x35   :  { %1274 = vst [vmem:[#allocation5 + $0x18] sm:$0xff] %v1547_v57  ;;  %v831_v2 = vmul.f32 %v1328_v31, %v703_v60  ;;  %v1395_v3 = vadd.s32 3229614080, %v398_v63  ;;  %v1333_v4 = vclamps-f32 %v68_v55, 448.0  ;;  %v323_v5 = vand.u32 2139095040, %v1332_v56 }
  0x36   :  { %v832_v6 = vmul.f32 %v1329_v32, %v704_v62  ;;  %v833_v7 = vmul.f32 %v1330_v38, %v705_v1  ;;  %v69_v8 = vunpack.c.l.bf16 %v30_v61  ;;  %v70_v9 = vunpack.c.h.bf16 %v30_v61 }
  0x37   :  { %v895_v10 = vadd.f32 12582912.0, %v831_v2  ;;  %v578_v11 = vadd.s32 1040187392, %v1395_v3  ;;  %v706_v12 = vsub.s32 1090519040, %v1395_v3  ;;  %v324_v13 = vand.u32 2139095040, %v1333_v4 }
  0x38   :  { %v896_v14 = vadd.f32 12582912.0, %v832_v6  ;;  %v897_v15 = vadd.f32 12582912.0, %v833_v7  ;;  %vm399_vm12 = vcmp.gt.s32.totalorder %v323_v5, 1015021568  ;;  %v1334_v20 = vclamps-f32 %v69_v8, 448.0  ;;  %v33_v6 = vld [vmem:[#allocation2 + $0x50] sm:$0xff] }
  0x39   :  { %v1456_v21 = vadd.f32 -12582912.0, %v895_v10  ;;  %v834_v22 = vmul.f32 %v1331_v42, %v706_v12  ;;  %v400_v23 = vsel %vm399_vm12, %v323_v5, 1015021568  ;;  %vm401_vm13 = vcmp.gt.s32.totalorder %v324_v13, 1015021568 }
  0x3a   :  { %v1457_v24 = vadd.f32 -12582912.0, %v896_v14  ;;  %v1458_v25 = vadd.f32 -12582912.0, %v897_v15  ;;  %v402_v26 = vsel %vm401_vm13, %v324_v13, 1015021568  ;;  %v1396_v27 = vadd.s32 3229614080, %v400_v23 }
  0x3b   :  { %v1023_v28 = vmul.f32 %v1456_v21, %v575_v58  ;;  %v898_v29 = vadd.f32 12582912.0, %v834_v22  ;;  %v1397_v16 = vadd.s32 3229614080, %v402_v26  ;;  %v1335_v17 = vclamps-f32 %v70_v9, 448.0 }
  0x3c   :  { %v1024_v31 = vmul.f32 %v1457_v24, %v576_v59  ;;  %v1025_v32 = vmul.f32 %v1458_v25, %v577_v0  ;;  %v579_v33 = vadd.s32 1040187392, %v1396_v27  ;;  %v707_v34 = vsub.s32 1090519040, %v1396_v27 }
  0x3d   :  { %v1459_v35 = vadd.f32 -12582912.0, %v898_v29  ;;  %v580_v36 = vadd.s32 1040187392, %v1397_v16  ;;  %v708_v37 = vsub.s32 1090519040, %v1397_v16  ;;  %v325_v38 = vand.u32 2139095040, %v1334_v20 }
  0x3e   :  { %v1548_v39 = vpack.c.bf16 %v1024_v31, %v1023_v28  ;;  %v835_v40 = vmul.f32 %v1332_v56, %v707_v34  ;;  %v326_v41 = vand.u32 2139095040, %v1335_v17  ;;  %v71_v42 = vunpack.c.l.bf16 %v31_v30 }
  0x3f   :  { %v1026_v43 = vmul.f32 %v1459_v35, %v578_v11  ;;  %v836_v44 = vmul.f32 %v1333_v4, %v708_v37  ;;  %vm403_vm14 = vcmp.gt.s32.totalorder %v325_v38, 1015021568  ;;  %v72_v45 = vunpack.c.h.bf16 %v31_v30 }
  0x40   :  { %1275 = vst [vmem:[#allocation5 + $0x20] sm:$0xff] %v1548_v39  ;;  %v899_v18 = vadd.f32 12582912.0, %v835_v40  ;;  %v404_v46 = vsel %vm403_vm14, %v325_v38, 1015021568  ;;  %vm405_vm15 = vcmp.gt.s32.totalorder %v326_v41, 1015021568  ;;  %v1336_v19 = vclamps-f32 %v71_v42, 448.0  ;;  %v34_v39 = vld [vmem:[#allocation2 + $0x58] sm:$0xff] }
  0x41   :  { %v1549_v48 = vpack.c.bf16 %v1026_v43, %v1025_v32  ;;  %v900_v49 = vadd.f32 12582912.0, %v836_v44  ;;  %v406_v50 = vsel %vm405_vm15, %v326_v41, 1015021568  ;;  %v1398_v51 = vadd.s32 3229614080, %v404_v46 }
  0x42   :  { %v1460_v52 = vadd.f32 -12582912.0, %v899_v18  ;;  %v1399_v53 = vadd.s32 3229614080, %v406_v50  ;;  %v1337_v54 = vclamps-f32 %v72_v45, 448.0  ;;  %v327_v55 = vand.u32 2139095040, %v1336_v19 }
  0x43   :  { %1276 = vst [vmem:[#allocation5 + $0x28] sm:$0xff] %v1549_v48  ;;  %v1461_v56 = vadd.f32 -12582912.0, %v900_v49  ;;  %v581_v57 = vadd.s32 1040187392, %v1398_v51  ;;  %v709_v58 = vsub.s32 1090519040, %v1398_v51  ;;  %v73_v59 = vunpack.c.l.bf16 %v32_v47 }
  0x44   :  { %v1027_v60 = vmul.f32 %v1460_v52, %v579_v33  ;;  %v582_v61 = vadd.s32 1040187392, %v1399_v53  ;;  %v710_v62 = vsub.s32 1090519040, %v1399_v53  ;;  %v328_v63 = vand.u32 2139095040, %v1337_v54 }
  0x45   :  { %v1028_v0 = vmul.f32 %v1461_v56, %v580_v36  ;;  %v837_v1 = vmul.f32 %v1334_v20, %v709_v58  ;;  %vm407_vm0 = vcmp.gt.s32.totalorder %v327_v55, 1015021568  ;;  %v74_v2 = vunpack.c.h.bf16 %v32_v47 }
  0x46   :  { %v838_v3 = vmul.f32 %v1335_v17, %v710_v62  ;;  %v408_v4 = vsel %vm407_vm0, %v327_v55, 1015021568  ;;  %vm409_vm1 = vcmp.gt.s32.totalorder %v328_v63, 1015021568  ;;  %v1338_v5 = vclamps-f32 %v73_v59, 448.0 }
  0x47   :  { %v1550_v7 = vpack.c.bf16 %v1028_v0, %v1027_v60  ;;  %v901_v8 = vadd.f32 12582912.0, %v837_v1  ;;  %v410_v9 = vsel %vm409_vm1, %v328_v63, 1015021568  ;;  %v1400_v10 = vadd.s32 3229614080, %v408_v4  ;;  %v35_v60 = vld [vmem:[#allocation2 + $0x60] sm:$0xff] }
  0x48   :  { %v902_v11 = vadd.f32 12582912.0, %v838_v3  ;;  %v1401_v12 = vadd.s32 3229614080, %v410_v9  ;;  %v1339_v13 = vclamps-f32 %v74_v2, 448.0  ;;  %v329_v14 = vand.u32 2139095040, %v1338_v5 }
  0x49   :  { %1277 = vst [vmem:[#allocation5 + $0x30] sm:$0xff] %v1550_v7  ;;  %v1462_v15 = vadd.f32 -12582912.0, %v901_v8  ;;  %v583_v21 = vadd.s32 1040187392, %v1400_v10  ;;  %v711_v22 = vsub.s32 1090519040, %v1400_v10  ;;  %v75_v20 = vunpack.c.l.bf16 %v33_v6 }
  0x4a   :  { %v1463_v23 = vadd.f32 -12582912.0, %v902_v11  ;;  %v584_v24 = vadd.s32 1040187392, %v1401_v12  ;;  %v712_v25 = vsub.s32 1090519040, %v1401_v12  ;;  %v330_v26 = vand.u32 2139095040, %v1339_v13 }
  0x4b   :  { %v1029_v27 = vmul.f32 %v1462_v15, %v581_v57  ;;  %v839_v28 = vmul.f32 %v1336_v19, %v711_v22  ;;  %vm411_vm2 = vcmp.gt.s32.totalorder %v329_v14, 1015021568  ;;  %v76_v29 = vunpack.c.h.bf16 %v33_v6  ;;  %v36_v15 = vld [vmem:[#allocation2 + $0x68] sm:$0xff] }
  0x4c   :  { %v1030_v16 = vmul.f32 %v1463_v23, %v582_v61  ;;  %v840_v17 = vmul.f32 %v1337_v54, %v712_v25  ;;  %v412_v30 = vsel %vm411_vm2, %v329_v14, 1015021568  ;;  %vm413_vm3 = vcmp.gt.s32.totalorder %v330_v26, 1015021568 }
  0x4d   :  { %v903_v31 = vadd.f32 12582912.0, %v839_v28  ;;  %v414_v32 = vsel %vm413_vm3, %v330_v26, 1015021568  ;;  %v1402_v33 = vadd.s32 3229614080, %v412_v30  ;;  %v1340_v34 = vclamps-f32 %v75_v20, 448.0 }
  0x4e   :  { %v1551_v35 = vpack.c.bf16 %v1030_v16, %v1029_v27  ;;  %v904_v36 = vadd.f32 12582912.0, %v840_v17  ;;  %v1403_v37 = vadd.s32 3229614080, %v414_v32  ;;  %v1341_v38 = vclamps-f32 %v76_v29, 448.0 }
  0x4f   :  { %v1464_v40 = vadd.f32 -12582912.0, %v903_v31  ;;  %v585_v41 = vadd.s32 1040187392, %v1402_v33  ;;  %v713_v42 = vsub.s32 1090519040, %v1402_v33  ;;  %v331_v43 = vand.u32 2139095040, %v1340_v34 }
  0x50   :  { %1278 = vst [vmem:[#allocation5 + $0x38] sm:$0xff] %v1551_v35  ;;  %v1465_v44 = vadd.f32 -12582912.0, %v904_v36  ;;  %v586_v45 = vadd.s32 1040187392, %v1403_v37  ;;  %v714_v18 = vsub.s32 1090519040, %v1403_v37  ;;  %v332_v46 = vand.u32 2139095040, %v1341_v38 }
  0x51   :  { %v1031_v19 = vmul.f32 %v1464_v40, %v583_v21  ;;  %v841_v47 = vmul.f32 %v1338_v5, %v713_v42  ;;  %vm415_vm4 = vcmp.gt.s32.totalorder %v331_v43, 1015021568  ;;  %v77_v48 = vunpack.c.l.bf16 %v34_v39  ;;  %v37_v40 = vld [vmem:[#allocation2 + $0x70] sm:$0xff] }
  0x52   :  { %v1032_v49 = vmul.f32 %v1465_v44, %v584_v24  ;;  %v842_v50 = vmul.f32 %v1339_v13, %v714_v18  ;;  %v416_v51 = vsel %vm415_vm4, %v331_v43, 1015021568  ;;  %vm417_vm5 = vcmp.gt.s32.totalorder %v332_v46, 1015021568 }
  0x53   :  { %v905_v52 = vadd.f32 12582912.0, %v841_v47  ;;  %v418_v53 = vsel %vm417_vm5, %v332_v46, 1015021568  ;;  %v1404_v54 = vadd.s32 3229614080, %v416_v51  ;;  %v78_v55 = vunpack.c.h.bf16 %v34_v39 }
  0x54   :  { %v1552_v56 = vpack.c.bf16 %v1032_v49, %v1031_v19  ;;  %v906_v57 = vadd.f32 12582912.0, %v842_v50  ;;  %v1405_v58 = vadd.s32 3229614080, %v418_v53  ;;  %v1342_v59 = vclamps-f32 %v77_v48, 448.0 }
  0x55   :  { %v1466_v61 = vadd.f32 -12582912.0, %v905_v52  ;;  %v587_v62 = vadd.s32 1040187392, %v1404_v54  ;;  %v715_v63 = vsub.s32 1090519040, %v1404_v54  ;;  %v1343_v0 = vclamps-f32 %v78_v55, 448.0 }
  0x56   :  { %1279 = vst [vmem:[#allocation5 + $0x40] sm:$0xff] %v1552_v56  ;;  %v1467_v1 = vadd.f32 -12582912.0, %v906_v57  ;;  %v588_v2 = vadd.s32 1040187392, %v1405_v58  ;;  %v716_v3 = vsub.s32 1090519040, %v1405_v58  ;;  %v333_v4 = vand.u32 2139095040, %v1342_v59 }
  0x57   :  { %v1033_v5 = vmul.f32 %v1466_v61, %v585_v41  ;;  %v843_v6 = vmul.f32 %v1340_v34, %v715_v63  ;;  %v334_v7 = vand.u32 2139095040, %v1343_v0  ;;  %v79_v8 = vunpack.c.l.bf16 %v35_v60 }
  0x58   :  { %v1034_v9 = vmul.f32 %v1467_v1, %v586_v45  ;;  %v844_v10 = vmul.f32 %v1341_v38, %v716_v3  ;;  %vm419_vm6 = vcmp.gt.s32.totalorder %v333_v4, 1015021568  ;;  %v80_v11 = vunpack.c.h.bf16 %v35_v60 }
  0x59   :  { %v907_v12 = vadd.f32 12582912.0, %v843_v6  ;;  %v420_v13 = vsel %vm419_vm6, %v333_v4, 1015021568  ;;  %vm421_vm7 = vcmp.gt.s32.totalorder %v334_v7, 1015021568  ;;  %v1344_v14 = vclamps-f32 %v79_v8, 448.0 }
  0x5a   :  { %v1553_v21 = vpack.c.bf16 %v1034_v9, %v1033_v5  ;;  %v908_v22 = vadd.f32 12582912.0, %v844_v10  ;;  %v422_v20 = vsel %vm421_vm7, %v334_v7, 1015021568  ;;  %v1406_v23 = vadd.s32 3229614080, %v420_v13  ;;  %v38_v5 = vld [vmem:[#allocation2 + $0x78] sm:$0xff] }
  0x5b   :  { %v1468_v24 = vadd.f32 -12582912.0, %v907_v12  ;;  %v1407_v25 = vadd.s32 3229614080, %v422_v20  ;;  %v1345_v26 = vclamps-f32 %v80_v11, 448.0  ;;  %v335_v27 = vand.u32 2139095040, %v1344_v14 }
  0x5c   :  { %1280 = vst [vmem:[#allocation5 + $0x48] sm:$0xff] %v1553_v21  ;;  %v1469_v28 = vadd.f32 -12582912.0, %v908_v22  ;;  %v589_v29 = vadd.s32 1040187392, %v1406_v23  ;;  %v717_v16 = vsub.s32 1090519040, %v1406_v23  ;;  %v81_v17 = vunpack.c.l.bf16 %v36_v15 }
  0x5d   :  { %v1035_v30 = vmul.f32 %v1468_v24, %v587_v62  ;;  %v590_v31 = vadd.s32 1040187392, %v1407_v25  ;;  %v718_v32 = vsub.s32 1090519040, %v1407_v25  ;;  %v336_v33 = vand.u32 2139095040, %v1345_v26 }
  0x5e   :  { %v1036_v34 = vmul.f32 %v1469_v28, %v588_v2  ;;  %v845_v35 = vmul.f32 %v1342_v59, %v717_v16  ;;  %vm423_vm8 = vcmp.gt.s32.totalorder %v335_v27, 1015021568  ;;  %v82_v36 = vunpack.c.h.bf16 %v36_v15 }
  0x5f   :  { %v846_v37 = vmul.f32 %v1343_v0, %v718_v32  ;;  %v424_v38 = vsel %vm423_vm8, %v335_v27, 1015021568  ;;  %vm425_vm9 = vcmp.gt.s32.totalorder %v336_v33, 1015021568  ;;  %v1346_v39 = vclamps-f32 %v81_v17, 448.0 }
  0x60   :  { %v1554_v41 = vpack.c.bf16 %v1036_v34, %v1035_v30  ;;  %v909_v42 = vadd.f32 12582912.0, %v845_v35  ;;  %v426_v43 = vsel %vm425_vm9, %v336_v33, 1015021568  ;;  %v1408_v44 = vadd.s32 3229614080, %v424_v38  ;;  %v39_v30 = vld [vmem:[#allocation2 + $0x80] sm:$0xff] }
  0x61   :  { %v910_v45 = vadd.f32 12582912.0, %v846_v37  ;;  %v1409_v18 = vadd.s32 3229614080, %v426_v43  ;;  %v1347_v46 = vclamps-f32 %v82_v36, 448.0  ;;  %v337_v19 = vand.u32 2139095040, %v1346_v39 }
  0x62   :  { %1281 = vst [vmem:[#allocation5 + $0x50] sm:$0xff] %v1554_v41  ;;  %v1470_v47 = vadd.f32 -12582912.0, %v909_v42  ;;  %v591_v48 = vadd.s32 1040187392, %v1408_v44  ;;  %v719_v49 = vsub.s32 1090519040, %v1408_v44  ;;  %v83_v50 = vunpack.c.l.bf16 %v37_v40 }
  0x63   :  { %v1471_v51 = vadd.f32 -12582912.0, %v910_v45  ;;  %v592_v52 = vadd.s32 1040187392, %v1409_v18  ;;  %v720_v53 = vsub.s32 1090519040, %v1409_v18  ;;  %v338_v54 = vand.u32 2139095040, %v1347_v46 }
  0x64   :  { %v1037_v55 = vmul.f32 %v1470_v47, %v589_v29  ;;  %v847_v56 = vmul.f32 %v1344_v14, %v719_v49  ;;  %vm427_vm10 = vcmp.gt.s32.totalorder %v337_v19, 1015021568  ;;  %v84_v57 = vunpack.c.h.bf16 %v37_v40  ;;  %v40_v47 = vld [vmem:[#allocation2 + $0x88] sm:$0xff] }
  0x65   :  { %v1038_v58 = vmul.f32 %v1471_v51, %v590_v31  ;;  %v848_v59 = vmul.f32 %v1345_v26, %v720_v53  ;;  %v428_v60 = vsel %vm427_vm10, %v337_v19, 1015021568  ;;  %vm429_vm11 = vcmp.gt.s32.totalorder %v338_v54, 1015021568 }
  0x66   :  { %v911_v61 = vadd.f32 12582912.0, %v847_v56  ;;  %v430_v62 = vsel %vm429_vm11, %v338_v54, 1015021568  ;;  %v1410_v63 = vadd.s32 3229614080, %v428_v60  ;;  %v1348_v0 = vclamps-f32 %v83_v50, 448.0 }
  0x67   :  { %v1555_v1 = vpack.c.bf16 %v1038_v58, %v1037_v55  ;;  %v912_v2 = vadd.f32 12582912.0, %v848_v59  ;;  %v1411_v3 = vadd.s32 3229614080, %v430_v62  ;;  %v1349_v4 = vclamps-f32 %v84_v57, 448.0 }
  0x68   :  { %v1472_v6 = vadd.f32 -12582912.0, %v911_v61  ;;  %v593_v7 = vadd.s32 1040187392, %v1410_v63  ;;  %v721_v8 = vsub.s32 1090519040, %v1410_v63  ;;  %v339_v9 = vand.u32 2139095040, %v1348_v0 }
  0x69   :  { %1282 = vst [vmem:[#allocation5 + $0x58] sm:$0xff] %v1555_v1  ;;  %v1473_v10 = vadd.f32 -12582912.0, %v912_v2  ;;  %v594_v11 = vadd.s32 1040187392, %v1411_v3  ;;  %v722_v12 = vsub.s32 1090519040, %v1411_v3  ;;  %v340_v13 = vand.u32 2139095040, %v1349_v4 }
  0x6a   :  { %v1039_v14 = vmul.f32 %v1472_v6, %v591_v48  ;;  %v849_v15 = vmul.f32 %v1346_v39, %v721_v8  ;;  %vm431_vm12 = vcmp.gt.s32.totalorder %v339_v9, 1015021568  ;;  %v85_v21 = vunpack.c.l.bf16 %v38_v5  ;;  %v41_v6 = vld [vmem:[#allocation2 + $0x90] sm:$0xff] }
  0x6b   :  { %v1040_v22 = vmul.f32 %v1473_v10, %v592_v52  ;;  %v850_v20 = vmul.f32 %v1347_v46, %v722_v12  ;;  %v432_v23 = vsel %vm431_vm12, %v339_v9, 1015021568  ;;  %vm433_vm13 = vcmp.gt.s32.totalorder %v340_v13, 1015021568 }
  0x6c   :  { %v913_v24 = vadd.f32 12582912.0, %v849_v15  ;;  %v434_v25 = vsel %vm433_vm13, %v340_v13, 1015021568  ;;  %v1412_v26 = vadd.s32 3229614080, %v432_v23  ;;  %v86_v27 = vunpack.c.h.bf16 %v38_v5 }
  0x6d   :  { %v1556_v28 = vpack.c.bf16 %v1040_v22, %v1039_v14  ;;  %v914_v29 = vadd.f32 12582912.0, %v850_v20  ;;  %v1413_v16 = vadd.s32 3229614080, %v434_v25  ;;  %v1350_v17 = vclamps-f32 %v85_v21, 448.0 }
  0x6e   :  { %v1474_v31 = vadd.f32 -12582912.0, %v913_v24  ;;  %v595_v32 = vadd.s32 1040187392, %v1412_v26  ;;  %v723_v33 = vsub.s32 1090519040, %v1412_v26  ;;  %v1351_v34 = vclamps-f32 %v86_v27, 448.0 }
  0x6f   :  { %1283 = vst [vmem:[#allocation5 + $0x60] sm:$0xff] %v1556_v28  ;;  %v1475_v35 = vadd.f32 -12582912.0, %v914_v29  ;;  %v596_v36 = vadd.s32 1040187392, %v1413_v16  ;;  %v724_v37 = vsub.s32 1090519040, %v1413_v16  ;;  %v341_v38 = vand.u32 2139095040, %v1350_v17 }
  0x70   :  { %v1041_v39 = vmul.f32 %v1474_v31, %v593_v7  ;;  %v851_v40 = vmul.f32 %v1348_v0, %v723_v33  ;;  %v342_v41 = vand.u32 2139095040, %v1351_v34  ;;  %v87_v42 = vunpack.c.l.bf16 %v39_v30 }
  0x71   :  { %v1042_v43 = vmul.f32 %v1475_v35, %v594_v11  ;;  %v852_v44 = vmul.f32 %v1349_v4, %v724_v37  ;;  %vm435_vm14 = vcmp.gt.s32.totalorder %v341_v38, 1015021568  ;;  %v88_v45 = vunpack.c.h.bf16 %v39_v30 }
  0x72   :  { %v915_v18 = vadd.f32 12582912.0, %v851_v40  ;;  %v436_v46 = vsel %vm435_vm14, %v341_v38, 1015021568  ;;  %vm437_vm15 = vcmp.gt.s32.totalorder %v342_v41, 1015021568  ;;  %v1352_v19 = vclamps-f32 %v87_v42, 448.0 }
  0x73   :  { %v1557_v48 = vpack.c.bf16 %v1042_v43, %v1041_v39  ;;  %v916_v49 = vadd.f32 12582912.0, %v852_v44  ;;  %v438_v50 = vsel %vm437_vm15, %v342_v41, 1015021568  ;;  %v1414_v51 = vadd.s32 3229614080, %v436_v46  ;;  %v42_v39 = vld [vmem:[#allocation2 + $0x98] sm:$0xff] }
  0x74   :  { %v1476_v52 = vadd.f32 -12582912.0, %v915_v18  ;;  %v1415_v53 = vadd.s32 3229614080, %v438_v50  ;;  %v1353_v54 = vclamps-f32 %v88_v45, 448.0  ;;  %v343_v55 = vand.u32 2139095040, %v1352_v19 }
  0x75   :  { %1284 = vst [vmem:[#allocation5 + $0x68] sm:$0xff] %v1557_v48  ;;  %v1477_v56 = vadd.f32 -12582912.0, %v916_v49  ;;  %v597_v57 = vadd.s32 1040187392, %v1414_v51  ;;  %v725_v58 = vsub.s32 1090519040, %v1414_v51  ;;  %v89_v59 = vunpack.c.l.bf16 %v40_v47 }
  0x76   :  { %v1043_v60 = vmul.f32 %v1476_v52, %v595_v32  ;;  %v598_v61 = vadd.s32 1040187392, %v1415_v53  ;;  %v726_v62 = vsub.s32 1090519040, %v1415_v53  ;;  %v344_v63 = vand.u32 2139095040, %v1353_v54 }
  0x77   :  { %v1044_v0 = vmul.f32 %v1477_v56, %v596_v36  ;;  %v853_v1 = vmul.f32 %v1350_v17, %v725_v58  ;;  %vm439_vm0 = vcmp.gt.s32.totalorder %v343_v55, 1015021568  ;;  %v90_v2 = vunpack.c.h.bf16 %v40_v47 }
  0x78   :  { %v854_v3 = vmul.f32 %v1351_v34, %v726_v62  ;;  %v440_v4 = vsel %vm439_vm0, %v343_v55, 1015021568  ;;  %vm441_vm1 = vcmp.gt.s32.totalorder %v344_v63, 1015021568  ;;  %v1354_v5 = vclamps-f32 %v89_v59, 448.0 }
  0x79   :  { %v1558_v7 = vpack.c.bf16 %v1044_v0, %v1043_v60  ;;  %v917_v8 = vadd.f32 12582912.0, %v853_v1  ;;  %v442_v9 = vsel %vm441_vm1, %v344_v63, 1015021568  ;;  %v1416_v10 = vadd.s32 3229614080, %v440_v4  ;;  %v43_v60 = vld [vmem:[#allocation2 + $0xa0] sm:$0xff] }
  0x7a   :  { %v918_v11 = vadd.f32 12582912.0, %v854_v3  ;;  %v1417_v12 = vadd.s32 3229614080, %v442_v9  ;;  %v1355_v13 = vclamps-f32 %v90_v2, 448.0  ;;  %v345_v14 = vand.u32 2139095040, %v1354_v5 }
  0x7b   :  { %1285 = vst [vmem:[#allocation5 + $0x70] sm:$0xff] %v1558_v7  ;;  %v1478_v15 = vadd.f32 -12582912.0, %v917_v8  ;;  %v599_v21 = vadd.s32 1040187392, %v1416_v10  ;;  %v727_v22 = vsub.s32 1090519040, %v1416_v10  ;;  %v91_v20 = vunpack.c.l.bf16 %v41_v6 }
  0x7c   :  { %v1479_v23 = vadd.f32 -12582912.0, %v918_v11  ;;  %v600_v24 = vadd.s32 1040187392, %v1417_v12  ;;  %v728_v25 = vsub.s32 1090519040, %v1417_v12  ;;  %v346_v26 = vand.u32 2139095040, %v1355_v13 }
  0x7d   :  { %v1045_v27 = vmul.f32 %v1478_v15, %v597_v57  ;;  %v855_v28 = vmul.f32 %v1352_v19, %v727_v22  ;;  %vm443_vm2 = vcmp.gt.s32.totalorder %v345_v14, 1015021568  ;;  %v92_v29 = vunpack.c.h.bf16 %v41_v6  ;;  %v44_v15 = vld [vmem:[#allocation2 + $0xa8] sm:$0xff] }
  0x7e   :  { %v1046_v16 = vmul.f32 %v1479_v23, %v598_v61  ;;  %v856_v17 = vmul.f32 %v1353_v54, %v728_v25  ;;  %v444_v30 = vsel %vm443_vm2, %v345_v14, 1015021568  ;;  %vm445_vm3 = vcmp.gt.s32.totalorder %v346_v26, 1015021568 }
  0x7f   :  { %v919_v31 = vadd.f32 12582912.0, %v855_v28  ;;  %v446_v32 = vsel %vm445_vm3, %v346_v26, 1015021568  ;;  %v1418_v33 = vadd.s32 3229614080, %v444_v30  ;;  %v1356_v34 = vclamps-f32 %v91_v20, 448.0 }
  0x80   :  { %v1559_v35 = vpack.c.bf16 %v1046_v16, %v1045_v27  ;;  %v920_v36 = vadd.f32 12582912.0, %v856_v17  ;;  %v1419_v37 = vadd.s32 3229614080, %v446_v32  ;;  %v1357_v38 = vclamps-f32 %v92_v29, 448.0 }
  0x81   :  { %v1480_v40 = vadd.f32 -12582912.0, %v919_v31  ;;  %v601_v41 = vadd.s32 1040187392, %v1418_v33  ;;  %v729_v42 = vsub.s32 1090519040, %v1418_v33  ;;  %v347_v43 = vand.u32 2139095040, %v1356_v34 }
  0x82   :  { %1286 = vst [vmem:[#allocation5 + $0x78] sm:$0xff] %v1559_v35  ;;  %v1481_v44 = vadd.f32 -12582912.0, %v920_v36  ;;  %v602_v45 = vadd.s32 1040187392, %v1419_v37  ;;  %v730_v18 = vsub.s32 1090519040, %v1419_v37  ;;  %v348_v46 = vand.u32 2139095040, %v1357_v38 }
  0x83   :  { %v1047_v19 = vmul.f32 %v1480_v40, %v599_v21  ;;  %v857_v47 = vmul.f32 %v1354_v5, %v729_v42  ;;  %vm447_vm4 = vcmp.gt.s32.totalorder %v347_v43, 1015021568  ;;  %v93_v48 = vunpack.c.l.bf16 %v42_v39  ;;  %v45_v40 = vld [vmem:[#allocation2 + $0xb0] sm:$0xff] }
  0x84   :  { %v1048_v49 = vmul.f32 %v1481_v44, %v600_v24  ;;  %v858_v50 = vmul.f32 %v1355_v13, %v730_v18  ;;  %v448_v51 = vsel %vm447_vm4, %v347_v43, 1015021568  ;;  %vm449_vm5 = vcmp.gt.s32.totalorder %v348_v46, 1015021568 }
  0x85   :  { %v921_v52 = vadd.f32 12582912.0, %v857_v47  ;;  %v450_v53 = vsel %vm449_vm5, %v348_v46, 1015021568  ;;  %v1420_v54 = vadd.s32 3229614080, %v448_v51  ;;  %v94_v55 = vunpack.c.h.bf16 %v42_v39 }
  0x86   :  { %v1560_v56 = vpack.c.bf16 %v1048_v49, %v1047_v19  ;;  %v922_v57 = vadd.f32 12582912.0, %v858_v50  ;;  %v1421_v58 = vadd.s32 3229614080, %v450_v53  ;;  %v1358_v59 = vclamps-f32 %v93_v48, 448.0 }
  0x87   :  { %v1482_v61 = vadd.f32 -12582912.0, %v921_v52  ;;  %v603_v62 = vadd.s32 1040187392, %v1420_v54  ;;  %v731_v63 = vsub.s32 1090519040, %v1420_v54  ;;  %v1359_v0 = vclamps-f32 %v94_v55, 448.0 }
  0x88   :  { %1287 = vst [vmem:[#allocation5 + $0x80] sm:$0xff] %v1560_v56  ;;  %v1483_v1 = vadd.f32 -12582912.0, %v922_v57  ;;  %v604_v2 = vadd.s32 1040187392, %v1421_v58  ;;  %v732_v3 = vsub.s32 1090519040, %v1421_v58  ;;  %v349_v4 = vand.u32 2139095040, %v1358_v59 }
  0x89   :  { %v1049_v5 = vmul.f32 %v1482_v61, %v601_v41  ;;  %v859_v6 = vmul.f32 %v1356_v34, %v731_v63  ;;  %v350_v7 = vand.u32 2139095040, %v1359_v0  ;;  %v95_v8 = vunpack.c.l.bf16 %v43_v60 }
  0x8a   :  { %v1050_v9 = vmul.f32 %v1483_v1, %v602_v45  ;;  %v860_v10 = vmul.f32 %v1357_v38, %v732_v3  ;;  %vm451_vm6 = vcmp.gt.s32.totalorder %v349_v4, 1015021568  ;;  %v96_v11 = vunpack.c.h.bf16 %v43_v60 }
  0x8b   :  { %v923_v12 = vadd.f32 12582912.0, %v859_v6  ;;  %v452_v13 = vsel %vm451_vm6, %v349_v4, 1015021568  ;;  %vm453_vm7 = vcmp.gt.s32.totalorder %v350_v7, 1015021568  ;;  %v1360_v14 = vclamps-f32 %v95_v8, 448.0 }
  0x8c   :  { %v1561_v21 = vpack.c.bf16 %v1050_v9, %v1049_v5  ;;  %v924_v22 = vadd.f32 12582912.0, %v860_v10  ;;  %v454_v20 = vsel %vm453_vm7, %v350_v7, 1015021568  ;;  %v1422_v23 = vadd.s32 3229614080, %v452_v13  ;;  %v46_v5 = vld [vmem:[#allocation2 + $0xb8] sm:$0xff] }
  0x8d   :  { %v1484_v24 = vadd.f32 -12582912.0, %v923_v12  ;;  %v1423_v25 = vadd.s32 3229614080, %v454_v20  ;;  %v1361_v26 = vclamps-f32 %v96_v11, 448.0  ;;  %v351_v27 = vand.u32 2139095040, %v1360_v14 }
  0x8e   :  { %1288 = vst [vmem:[#allocation5 + $0x88] sm:$0xff] %v1561_v21  ;;  %v1485_v28 = vadd.f32 -12582912.0, %v924_v22  ;;  %v605_v29 = vadd.s32 1040187392, %v1422_v23  ;;  %v733_v16 = vsub.s32 1090519040, %v1422_v23  ;;  %v97_v17 = vunpack.c.l.bf16 %v44_v15 }
  0x8f   :  { %v1051_v30 = vmul.f32 %v1484_v24, %v603_v62  ;;  %v606_v31 = vadd.s32 1040187392, %v1423_v25  ;;  %v734_v32 = vsub.s32 1090519040, %v1423_v25  ;;  %v352_v33 = vand.u32 2139095040, %v1361_v26 }
  0x90   :  { %v1052_v34 = vmul.f32 %v1485_v28, %v604_v2  ;;  %v861_v35 = vmul.f32 %v1358_v59, %v733_v16  ;;  %vm455_vm8 = vcmp.gt.s32.totalorder %v351_v27, 1015021568  ;;  %v98_v36 = vunpack.c.h.bf16 %v44_v15 }
  0x91   :  { %v862_v37 = vmul.f32 %v1359_v0, %v734_v32  ;;  %v456_v38 = vsel %vm455_vm8, %v351_v27, 1015021568  ;;  %vm457_vm9 = vcmp.gt.s32.totalorder %v352_v33, 1015021568  ;;  %v1362_v39 = vclamps-f32 %v97_v17, 448.0 }
  0x92   :  { %v1562_v41 = vpack.c.bf16 %v1052_v34, %v1051_v30  ;;  %v925_v42 = vadd.f32 12582912.0, %v861_v35  ;;  %v458_v43 = vsel %vm457_vm9, %v352_v33, 1015021568  ;;  %v1424_v44 = vadd.s32 3229614080, %v456_v38  ;;  %v47_v30 = vld [vmem:[#allocation2 + $0xc0] sm:$0xff] }
  0x93   :  { %v926_v45 = vadd.f32 12582912.0, %v862_v37  ;;  %v1425_v18 = vadd.s32 3229614080, %v458_v43  ;;  %v1363_v46 = vclamps-f32 %v98_v36, 448.0  ;;  %v353_v19 = vand.u32 2139095040, %v1362_v39 }
  0x94   :  { %1289 = vst [vmem:[#allocation5 + $0x90] sm:$0xff] %v1562_v41  ;;  %v1486_v47 = vadd.f32 -12582912.0, %v925_v42  ;;  %v607_v48 = vadd.s32 1040187392, %v1424_v44  ;;  %v735_v49 = vsub.s32 1090519040, %v1424_v44  ;;  %v99_v50 = vunpack.c.l.bf16 %v45_v40 }
  0x95   :  { %v1487_v51 = vadd.f32 -12582912.0, %v926_v45  ;;  %v608_v52 = vadd.s32 1040187392, %v1425_v18  ;;  %v736_v53 = vsub.s32 1090519040, %v1425_v18  ;;  %v354_v54 = vand.u32 2139095040, %v1363_v46 }
  0x96   :  { %v1053_v55 = vmul.f32 %v1486_v47, %v605_v29  ;;  %v863_v56 = vmul.f32 %v1360_v14, %v735_v49  ;;  %vm459_vm10 = vcmp.gt.s32.totalorder %v353_v19, 1015021568  ;;  %v100_v57 = vunpack.c.h.bf16 %v45_v40  ;;  %v48_v47 = vld [vmem:[#allocation2 + $0xc8] sm:$0xff] }
  0x97   :  { %v1054_v58 = vmul.f32 %v1487_v51, %v606_v31  ;;  %v864_v59 = vmul.f32 %v1361_v26, %v736_v53  ;;  %v460_v60 = vsel %vm459_vm10, %v353_v19, 1015021568  ;;  %vm461_vm11 = vcmp.gt.s32.totalorder %v354_v54, 1015021568 }
  0x98   :  { %v927_v61 = vadd.f32 12582912.0, %v863_v56  ;;  %v462_v62 = vsel %vm461_vm11, %v354_v54, 1015021568  ;;  %v1426_v63 = vadd.s32 3229614080, %v460_v60  ;;  %v1364_v0 = vclamps-f32 %v99_v50, 448.0 }
  0x99   :  { %v1563_v1 = vpack.c.bf16 %v1054_v58, %v1053_v55  ;;  %v928_v2 = vadd.f32 12582912.0, %v864_v59  ;;  %v1427_v3 = vadd.s32 3229614080, %v462_v62  ;;  %v1365_v4 = vclamps-f32 %v100_v57, 448.0 }
  0x9a   :  { %v1488_v6 = vadd.f32 -12582912.0, %v927_v61  ;;  %v609_v7 = vadd.s32 1040187392, %v1426_v63  ;;  %v737_v8 = vsub.s32 1090519040, %v1426_v63  ;;  %v355_v9 = vand.u32 2139095040, %v1364_v0 }
  0x9b   :  { %1290 = vst [vmem:[#allocation5 + $0x98] sm:$0xff] %v1563_v1  ;;  %v1489_v10 = vadd.f32 -12582912.0, %v928_v2  ;;  %v610_v11 = vadd.s32 1040187392, %v1427_v3  ;;  %v738_v12 = vsub.s32 1090519040, %v1427_v3  ;;  %v356_v13 = vand.u32 2139095040, %v1365_v4 }
  0x9c   :  { %v1055_v14 = vmul.f32 %v1488_v6, %v607_v48  ;;  %v865_v15 = vmul.f32 %v1362_v39, %v737_v8  ;;  %vm463_vm12 = vcmp.gt.s32.totalorder %v355_v9, 1015021568  ;;  %v101_v21 = vunpack.c.l.bf16 %v46_v5  ;;  %v49_v6 = vld [vmem:[#allocation2 + $0xd0] sm:$0xff] }
  0x9d   :  { %v1056_v22 = vmul.f32 %v1489_v10, %v608_v52  ;;  %v866_v20 = vmul.f32 %v1363_v46, %v738_v12  ;;  %v464_v23 = vsel %vm463_vm12, %v355_v9, 1015021568  ;;  %vm465_vm13 = vcmp.gt.s32.totalorder %v356_v13, 1015021568 }
  0x9e   :  { %v929_v24 = vadd.f32 12582912.0, %v865_v15  ;;  %v466_v25 = vsel %vm465_vm13, %v356_v13, 1015021568  ;;  %v1428_v26 = vadd.s32 3229614080, %v464_v23  ;;  %v102_v27 = vunpack.c.h.bf16 %v46_v5 }
  0x9f   :  { %v1564_v28 = vpack.c.bf16 %v1056_v22, %v1055_v14  ;;  %v930_v29 = vadd.f32 12582912.0, %v866_v20  ;;  %v1429_v16 = vadd.s32 3229614080, %v466_v25  ;;  %v1366_v17 = vclamps-f32 %v101_v21, 448.0 }
  0xa0   :  { %v1490_v31 = vadd.f32 -12582912.0, %v929_v24  ;;  %v611_v32 = vadd.s32 1040187392, %v1428_v26  ;;  %v739_v33 = vsub.s32 1090519040, %v1428_v26  ;;  %v1367_v34 = vclamps-f32 %v102_v27, 448.0 }
  0xa1   :  { %1291 = vst [vmem:[#allocation5 + $0xa0] sm:$0xff] %v1564_v28  ;;  %v1491_v35 = vadd.f32 -12582912.0, %v930_v29  ;;  %v612_v36 = vadd.s32 1040187392, %v1429_v16  ;;  %v740_v37 = vsub.s32 1090519040, %v1429_v16  ;;  %v357_v38 = vand.u32 2139095040, %v1366_v17 }
  0xa2   :  { %v1057_v39 = vmul.f32 %v1490_v31, %v609_v7  ;;  %v867_v40 = vmul.f32 %v1364_v0, %v739_v33  ;;  %v358_v41 = vand.u32 2139095040, %v1367_v34  ;;  %v103_v42 = vunpack.c.l.bf16 %v47_v30 }
  0xa3   :  { %v1058_v43 = vmul.f32 %v1491_v35, %v610_v11  ;;  %v868_v44 = vmul.f32 %v1365_v4, %v740_v37  ;;  %vm467_vm14 = vcmp.gt.s32.totalorder %v357_v38, 1015021568  ;;  %v104_v45 = vunpack.c.h.bf16 %v47_v30 }
  0xa4   :  { %v931_v18 = vadd.f32 12582912.0, %v867_v40  ;;  %v468_v46 = vsel %vm467_vm14, %v357_v38, 1015021568  ;;  %vm469_vm15 = vcmp.gt.s32.totalorder %v358_v41, 1015021568  ;;  %v1368_v19 = vclamps-f32 %v103_v42, 448.0 }
  0xa5   :  { %v1565_v48 = vpack.c.bf16 %v1058_v43, %v1057_v39  ;;  %v932_v49 = vadd.f32 12582912.0, %v868_v44  ;;  %v470_v50 = vsel %vm469_vm15, %v358_v41, 1015021568  ;;  %v1430_v51 = vadd.s32 3229614080, %v468_v46  ;;  %v50_v39 = vld [vmem:[#allocation2 + $0xd8] sm:$0xff] }
  0xa6   :  { %v1492_v52 = vadd.f32 -12582912.0, %v931_v18  ;;  %v1431_v53 = vadd.s32 3229614080, %v470_v50  ;;  %v1369_v54 = vclamps-f32 %v104_v45, 448.0  ;;  %v359_v55 = vand.u32 2139095040, %v1368_v19 }
  0xa7   :  { %1292 = vst [vmem:[#allocation5 + $0xa8] sm:$0xff] %v1565_v48  ;;  %v1493_v56 = vadd.f32 -12582912.0, %v932_v49  ;;  %v613_v57 = vadd.s32 1040187392, %v1430_v51  ;;  %v741_v58 = vsub.s32 1090519040, %v1430_v51  ;;  %v105_v59 = vunpack.c.l.bf16 %v48_v47 }
  0xa8   :  { %v1059_v60 = vmul.f32 %v1492_v52, %v611_v32  ;;  %v614_v61 = vadd.s32 1040187392, %v1431_v53  ;;  %v742_v62 = vsub.s32 1090519040, %v1431_v53  ;;  %v360_v63 = vand.u32 2139095040, %v1369_v54 }
  0xa9   :  { %v1060_v0 = vmul.f32 %v1493_v56, %v612_v36  ;;  %v869_v1 = vmul.f32 %v1366_v17, %v741_v58  ;;  %vm471_vm0 = vcmp.gt.s32.totalorder %v359_v55, 1015021568  ;;  %v106_v2 = vunpack.c.h.bf16 %v48_v47 }
  0xaa   :  { %v870_v3 = vmul.f32 %v1367_v34, %v742_v62  ;;  %v472_v4 = vsel %vm471_vm0, %v359_v55, 1015021568  ;;  %vm473_vm1 = vcmp.gt.s32.totalorder %v360_v63, 1015021568  ;;  %v1370_v5 = vclamps-f32 %v105_v59, 448.0 }
  0xab   :  { %v1566_v7 = vpack.c.bf16 %v1060_v0, %v1059_v60  ;;  %v933_v8 = vadd.f32 12582912.0, %v869_v1  ;;  %v474_v9 = vsel %vm473_vm1, %v360_v63, 1015021568  ;;  %v1432_v10 = vadd.s32 3229614080, %v472_v4  ;;  %v51_v60 = vld [vmem:[#allocation2 + $0xe0] sm:$0xff] }
  0xac   :  { %v934_v11 = vadd.f32 12582912.0, %v870_v3  ;;  %v1433_v12 = vadd.s32 3229614080, %v474_v9  ;;  %v1371_v13 = vclamps-f32 %v106_v2, 448.0  ;;  %v361_v14 = vand.u32 2139095040, %v1370_v5 }
  0xad   :  { %1293 = vst [vmem:[#allocation5 + $0xb0] sm:$0xff] %v1566_v7  ;;  %v1494_v15 = vadd.f32 -12582912.0, %v933_v8  ;;  %v615_v21 = vadd.s32 1040187392, %v1432_v10  ;;  %v743_v22 = vsub.s32 1090519040, %v1432_v10  ;;  %v107_v20 = vunpack.c.l.bf16 %v49_v6 }
  0xae   :  { %v1495_v23 = vadd.f32 -12582912.0, %v934_v11  ;;  %v616_v24 = vadd.s32 1040187392, %v1433_v12  ;;  %v744_v25 = vsub.s32 1090519040, %v1433_v12  ;;  %v362_v26 = vand.u32 2139095040, %v1371_v13 }
  0xaf   :  { %v1061_v27 = vmul.f32 %v1494_v15, %v613_v57  ;;  %v871_v28 = vmul.f32 %v1368_v19, %v743_v22  ;;  %vm475_vm2 = vcmp.gt.s32.totalorder %v361_v14, 1015021568  ;;  %v108_v29 = vunpack.c.h.bf16 %v49_v6  ;;  %v52_v15 = vld [vmem:[#allocation2 + $0xe8] sm:$0xff] }
  0xb0   :  { %v1062_v16 = vmul.f32 %v1495_v23, %v614_v61  ;;  %v872_v17 = vmul.f32 %v1369_v54, %v744_v25  ;;  %v476_v30 = vsel %vm475_vm2, %v361_v14, 1015021568  ;;  %vm477_vm3 = vcmp.gt.s32.totalorder %v362_v26, 1015021568 }
  0xb1   :  { %v935_v31 = vadd.f32 12582912.0, %v871_v28  ;;  %v478_v32 = vsel %vm477_vm3, %v362_v26, 1015021568  ;;  %v1434_v33 = vadd.s32 3229614080, %v476_v30  ;;  %v1372_v34 = vclamps-f32 %v107_v20, 448.0 }
  0xb2   :  { %v1567_v35 = vpack.c.bf16 %v1062_v16, %v1061_v27  ;;  %v936_v36 = vadd.f32 12582912.0, %v872_v17  ;;  %v1435_v37 = vadd.s32 3229614080, %v478_v32  ;;  %v1373_v38 = vclamps-f32 %v108_v29, 448.0 }
  0xb3   :  { %v1496_v40 = vadd.f32 -12582912.0, %v935_v31  ;;  %v617_v41 = vadd.s32 1040187392, %v1434_v33  ;;  %v745_v42 = vsub.s32 1090519040, %v1434_v33  ;;  %v363_v43 = vand.u32 2139095040, %v1372_v34 }
  0xb4   :  { %1294 = vst [vmem:[#allocation5 + $0xb8] sm:$0xff] %v1567_v35  ;;  %v1497_v44 = vadd.f32 -12582912.0, %v936_v36  ;;  %v618_v45 = vadd.s32 1040187392, %v1435_v37  ;;  %v746_v18 = vsub.s32 1090519040, %v1435_v37  ;;  %v364_v46 = vand.u32 2139095040, %v1373_v38 }
  0xb5   :  { %v1063_v19 = vmul.f32 %v1496_v40, %v615_v21  ;;  %v873_v47 = vmul.f32 %v1370_v5, %v745_v42  ;;  %vm479_vm4 = vcmp.gt.s32.totalorder %v363_v43, 1015021568  ;;  %v109_v48 = vunpack.c.l.bf16 %v50_v39  ;;  %v53_v40 = vld [vmem:[#allocation2 + $0xf0] sm:$0xff] }
  0xb6   :  { %v1064_v49 = vmul.f32 %v1497_v44, %v616_v24  ;;  %v874_v50 = vmul.f32 %v1371_v13, %v746_v18  ;;  %v480_v51 = vsel %vm479_vm4, %v363_v43, 1015021568  ;;  %vm481_vm5 = vcmp.gt.s32.totalorder %v364_v46, 1015021568 }
  0xb7   :  { %v937_v52 = vadd.f32 12582912.0, %v873_v47  ;;  %v482_v53 = vsel %vm481_vm5, %v364_v46, 1015021568  ;;  %v1436_v54 = vadd.s32 3229614080, %v480_v51  ;;  %v110_v55 = vunpack.c.h.bf16 %v50_v39 }
  0xb8   :  { %v1568_v56 = vpack.c.bf16 %v1064_v49, %v1063_v19  ;;  %v938_v57 = vadd.f32 12582912.0, %v874_v50  ;;  %v1437_v58 = vadd.s32 3229614080, %v482_v53  ;;  %v1374_v59 = vclamps-f32 %v109_v48, 448.0 }
  0xb9   :  { %v1498_v61 = vadd.f32 -12582912.0, %v937_v52  ;;  %v619_v62 = vadd.s32 1040187392, %v1436_v54  ;;  %v747_v63 = vsub.s32 1090519040, %v1436_v54  ;;  %v1375_v0 = vclamps-f32 %v110_v55, 448.0 }
  0xba   :  { %1295 = vst [vmem:[#allocation5 + $0xc0] sm:$0xff] %v1568_v56  ;;  %v1499_v1 = vadd.f32 -12582912.0, %v938_v57  ;;  %v620_v2 = vadd.s32 1040187392, %v1437_v58  ;;  %v748_v3 = vsub.s32 1090519040, %v1437_v58  ;;  %v365_v4 = vand.u32 2139095040, %v1374_v59 }
  0xbb   :  { %v1065_v5 = vmul.f32 %v1498_v61, %v617_v41  ;;  %v875_v6 = vmul.f32 %v1372_v34, %v747_v63  ;;  %v366_v7 = vand.u32 2139095040, %v1375_v0  ;;  %v111_v8 = vunpack.c.l.bf16 %v51_v60 }
  0xbc   :  { %v1066_v9 = vmul.f32 %v1499_v1, %v618_v45  ;;  %v876_v10 = vmul.f32 %v1373_v38, %v748_v3  ;;  %vm483_vm6 = vcmp.gt.s32.totalorder %v365_v4, 1015021568  ;;  %v112_v11 = vunpack.c.h.bf16 %v51_v60 }
  0xbd   :  { %v939_v12 = vadd.f32 12582912.0, %v875_v6  ;;  %v484_v13 = vsel %vm483_vm6, %v365_v4, 1015021568  ;;  %vm485_vm7 = vcmp.gt.s32.totalorder %v366_v7, 1015021568  ;;  %v1376_v14 = vclamps-f32 %v111_v8, 448.0 }
  0xbe   :  { %v1569_v21 = vpack.c.bf16 %v1066_v9, %v1065_v5  ;;  %v940_v22 = vadd.f32 12582912.0, %v876_v10  ;;  %v486_v20 = vsel %vm485_vm7, %v366_v7, 1015021568  ;;  %v1438_v23 = vadd.s32 3229614080, %v484_v13  ;;  %v54_v5 = vld [vmem:[#allocation2 + $0xf8] sm:$0xff] }
  0xbf   :  { %v1500_v24 = vadd.f32 -12582912.0, %v939_v12  ;;  %v1439_v25 = vadd.s32 3229614080, %v486_v20  ;;  %v1377_v26 = vclamps-f32 %v112_v11, 448.0  ;;  %v367_v27 = vand.u32 2139095040, %v1376_v14 }
  0xc0   :  { %1296 = vst [vmem:[#allocation5 + $0xc8] sm:$0xff] %v1569_v21  ;;  %v1501_v28 = vadd.f32 -12582912.0, %v940_v22  ;;  %v621_v29 = vadd.s32 1040187392, %v1438_v23  ;;  %v749_v16 = vsub.s32 1090519040, %v1438_v23  ;;  %v113_v17 = vunpack.c.l.bf16 %v52_v15 }
  0xc1   :  { %v1067_v30 = vmul.f32 %v1500_v24, %v619_v62  ;;  %v622_v31 = vadd.s32 1040187392, %v1439_v25  ;;  %v750_v32 = vsub.s32 1090519040, %v1439_v25  ;;  %v368_v33 = vand.u32 2139095040, %v1377_v26 }
  0xc2   :  { %v1068_v34 = vmul.f32 %v1501_v28, %v620_v2  ;;  %v877_v35 = vmul.f32 %v1374_v59, %v749_v16  ;;  %vm487_vm8 = vcmp.gt.s32.totalorder %v367_v27, 1015021568  ;;  %v114_v36 = vunpack.c.h.bf16 %v52_v15 }
  0xc3   :  { %v878_v37 = vmul.f32 %v1375_v0, %v750_v32  ;;  %v488_v38 = vsel %vm487_vm8, %v367_v27, 1015021568  ;;  %vm489_vm9 = vcmp.gt.s32.totalorder %v368_v33, 1015021568  ;;  %v1378_v39 = vclamps-f32 %v113_v17, 448.0 }
  0xc4   :  { %v1570_v41 = vpack.c.bf16 %v1068_v34, %v1067_v30  ;;  %v941_v42 = vadd.f32 12582912.0, %v877_v35  ;;  %v490_v43 = vsel %vm489_vm9, %v368_v33, 1015021568  ;;  %v1440_v44 = vadd.s32 3229614080, %v488_v38 }
  0xc5   :  { %v942_v45 = vadd.f32 12582912.0, %v878_v37  ;;  %v1441_v18 = vadd.s32 3229614080, %v490_v43  ;;  %v1379_v46 = vclamps-f32 %v114_v36, 448.0  ;;  %v369_v19 = vand.u32 2139095040, %v1378_v39 }
  0xc6   :  { %1297 = vst [vmem:[#allocation5 + $0xd0] sm:$0xff] %v1570_v41  ;;  %v1502_v47 = vadd.f32 -12582912.0, %v941_v42  ;;  %v623_v48 = vadd.s32 1040187392, %v1440_v44  ;;  %v751_v49 = vsub.s32 1090519040, %v1440_v44  ;;  %v115_v50 = vunpack.c.l.bf16 %v53_v40 }
  0xc7   :  { %v1503_v51 = vadd.f32 -12582912.0, %v942_v45  ;;  %v624_v52 = vadd.s32 1040187392, %v1441_v18  ;;  %v752_v53 = vsub.s32 1090519040, %v1441_v18  ;;  %v370_v54 = vand.u32 2139095040, %v1379_v46 }
  0xc8   :  { %v1069_v55 = vmul.f32 %v1502_v47, %v621_v29  ;;  %v879_v56 = vmul.f32 %v1376_v14, %v751_v49  ;;  %vm491_vm10 = vcmp.gt.s32.totalorder %v369_v19, 1015021568  ;;  %v116_v57 = vunpack.c.h.bf16 %v53_v40 }
  0xc9   :  { %v1070_v58 = vmul.f32 %v1503_v51, %v622_v31  ;;  %v880_v59 = vmul.f32 %v1377_v26, %v752_v53  ;;  %v492_v60 = vsel %vm491_vm10, %v369_v19, 1015021568  ;;  %vm493_vm11 = vcmp.gt.s32.totalorder %v370_v54, 1015021568 }
  0xca   :  { %v943_v61 = vadd.f32 12582912.0, %v879_v56  ;;  %v494_v62 = vsel %vm493_vm11, %v370_v54, 1015021568  ;;  %v1442_v63 = vadd.s32 3229614080, %v492_v60  ;;  %v1380_v0 = vclamps-f32 %v115_v50, 448.0 }
  0xcb   :  { %v1571_v1 = vpack.c.bf16 %v1070_v58, %v1069_v55  ;;  %v944_v2 = vadd.f32 12582912.0, %v880_v59  ;;  %v1443_v3 = vadd.s32 3229614080, %v494_v62  ;;  %v1381_v4 = vclamps-f32 %v116_v57, 448.0 }
  0xcc   :  { %v1504_v6 = vadd.f32 -12582912.0, %v943_v61  ;;  %v625_v7 = vadd.s32 1040187392, %v1442_v63  ;;  %v753_v8 = vsub.s32 1090519040, %v1442_v63  ;;  %v371_v9 = vand.u32 2139095040, %v1380_v0 }
  0xcd   :  { %1298 = vst [vmem:[#allocation5 + $0xd8] sm:$0xff] %v1571_v1  ;;  %v1505_v10 = vadd.f32 -12582912.0, %v944_v2  ;;  %v626_v11 = vadd.s32 1040187392, %v1443_v3  ;;  %v754_v12 = vsub.s32 1090519040, %v1443_v3  ;;  %v372_v13 = vand.u32 2139095040, %v1381_v4 }
  0xce   :  { %v1071_v14 = vmul.f32 %v1504_v6, %v623_v48  ;;  %v881_v15 = vmul.f32 %v1378_v39, %v753_v8  ;;  %vm495_vm12 = vcmp.gt.s32.totalorder %v371_v9, 1015021568  ;;  %v117_v21 = vunpack.c.l.bf16 %v54_v5 }
  0xcf   :  { %v1072_v22 = vmul.f32 %v1505_v10, %v624_v52  ;;  %v882_v20 = vmul.f32 %v1379_v46, %v754_v12  ;;  %v496_v23 = vsel %vm495_vm12, %v371_v9, 1015021568  ;;  %vm497_vm13 = vcmp.gt.s32.totalorder %v372_v13, 1015021568 }
  0xd0   :  { %v945_v24 = vadd.f32 12582912.0, %v881_v15  ;;  %v498_v25 = vsel %vm497_vm13, %v372_v13, 1015021568  ;;  %v1444_v26 = vadd.s32 3229614080, %v496_v23  ;;  %v118_v27 = vunpack.c.h.bf16 %v54_v5 }
  0xd1   :  { %v1572_v28 = vpack.c.bf16 %v1072_v22, %v1071_v14  ;;  %v946_v29 = vadd.f32 12582912.0, %v882_v20  ;;  %v1445_v16 = vadd.s32 3229614080, %v498_v25  ;;  %v1382_v17 = vclamps-f32 %v117_v21, 448.0 }
  0xd2   :  { %v1506_v30 = vadd.f32 -12582912.0, %v945_v24  ;;  %v755_v31 = vsub.s32 1090519040, %v1444_v26  ;;  %v1383_v32 = vclamps-f32 %v118_v27, 448.0  ;;  %v627_v40 = vadd.s32 1040187392, %v1444_v26 }
  0xd3   :  { %1299 = vst [vmem:[#allocation5 + $0xe0] sm:$0xff] %v1572_v28  ;;  %v1507_v33 = vadd.f32 -12582912.0, %v946_v29  ;;  %v756_v34 = vsub.s32 1090519040, %v1445_v16  ;;  %v373_v35 = vand.u32 2139095040, %v1382_v17  ;;  %v628_v42 = vadd.s32 1040187392, %v1445_v16 }
  0xd4   :  { %v1073_v36 = vmul.f32 %v1506_v30, %v625_v7  ;;  %v883_v37 = vmul.f32 %v1380_v0, %v755_v31  ;;  %v374_v38 = vand.u32 2139095040, %v1383_v32 }
  0xd5   :  { %v1074_v39 = vmul.f32 %v1507_v33, %v626_v11  ;;  %v884_v41 = vmul.f32 %v1381_v4, %v756_v34  ;;  %vm499_vm14 = vcmp.gt.s32.totalorder %v373_v35, 1015021568 }
  0xd6   :  { %v947_v43 = vadd.f32 12582912.0, %v883_v37  ;;  %v500_v44 = vsel %vm499_vm14, %v373_v35, 1015021568  ;;  %vm501_vm15 = vcmp.gt.s32.totalorder %v374_v38, 1015021568 }
  0xd7   :  { %v1573_v45 = vpack.c.bf16 %v1074_v39, %v1073_v36  ;;  %v948_v18 = vadd.f32 12582912.0, %v884_v41  ;;  %v502_v46 = vsel %vm501_vm15, %v374_v38, 1015021568  ;;  %v1446_v19 = vadd.s32 3229614080, %v500_v44 }
  0xd8   :  { %v1508_v47 = vadd.f32 -12582912.0, %v947_v43  ;;  %v1447_v48 = vadd.s32 3229614080, %v502_v46 }
  0xd9   :  { %1300 = vst [vmem:[#allocation5 + $0xe8] sm:$0xff] %v1573_v45  ;;  %v1509_v49 = vadd.f32 -12582912.0, %v948_v18  ;;  %v757_v50 = vsub.s32 1090519040, %v1446_v19  ;;  %v629_v57 = vadd.s32 1040187392, %v1446_v19 }
  0xda   :  { %v1075_v51 = vmul.f32 %v1508_v47, %v627_v40  ;;  %v758_v52 = vsub.s32 1090519040, %v1447_v48  ;;  %v630_v59 = vadd.s32 1040187392, %v1447_v48 }
  0xdb   :  { %v1076_v53 = vmul.f32 %v1509_v49, %v628_v42  ;;  %v885_v54 = vmul.f32 %v1382_v17, %v757_v50 }
  0xdc   :  { %v886_v55 = vmul.f32 %v1383_v32, %v758_v52 }
  0xdd   :  { %v1574_v56 = vpack.c.bf16 %v1076_v53, %v1075_v51  ;;  %v949_v58 = vadd.f32 12582912.0, %v885_v54 }
  0xde   :  { %v950_v60 = vadd.f32 12582912.0, %v886_v55 }
  0xdf   :  { %1301 = vst [vmem:[#allocation5 + $0xf0] sm:$0xff] %v1574_v56  ;;  %v1510_v61 = vadd.f32 -12582912.0, %v949_v58 }
  0xe0   :  { %v1511_v62 = vadd.f32 -12582912.0, %v950_v60 }
  0xe1   :  { %v1077_v63 = vmul.f32 %v1510_v61, %v629_v57 }
  0xe2   :  { %v1078_v0 = vmul.f32 %v1511_v62, %v630_v59 }
  0xe4   :  { %v1575_v1 = vpack.c.bf16 %v1078_v0, %v1077_v63 }
  0xe6   :  { %1302 = vst [vmem:[#allocation5 + $0xf8] sm:$0xff] %v1575_v1 }
  0xe7   :  { %1613 = shalt.err (!%p1610_p12)
}
  0xe8   :  { %s1614_s24 = scalar_lea.hbm %s1693_s1, 4096 }
  0xe9   :  { %p1615_p13 = scmp.ne.s32.totalorder %s1693_s1, %s1614_s24  ;;  %p1618_p0 = scmp.lt.u32.totalorder %s1614_s24, %s1693_s1 }
  0xeb   :  { %p1620_p1 = pnand %p1618_p0, %p1615_p13 }
  0xed   :  { %1623 = shalt.err (!%p1620_p1)
}
  0xee   :  { %1314 = dma.vmem_to_hbm [thread:$0]  %s1309_s20, 4096, %s1693_s1, [#allocation4], %s1629_s16, %s1629_s16, %s1630_s17  }
  0xef   :  { %1626 = dma.done.wait [#allocation4], 4096  }
  0xf0   :  { %1627 = vsyncadd [#allocation4], 4294963200 }
  0xf1   :  { %1318 = vsyncpa [#allocation3], 1 }
  0xf2   :  { %1319 = vsyncpa [#allocation4], 1 }

</bundles_post_ra>
